<compile_context>
chip_gen: v6e
topology: v6e:2x2x1
jax: 0.10.0
libtpu: 0.0.40
codegen_flags: <defaults>
</compile_context>

<pallas_src>
import functools

import jax
import jax.numpy as jnp
from jax.experimental import pallas as pl
from jax.experimental.pallas import tpu as pltpu


def _ce_kernel(w_ref, x_ref, t_ref, num_ref, den_ref, num_acc, den_acc, *,
               num_classes, r_tile, r_acc, groups, num_tiles, tiles_per_split,
               rows_true, needs_mask):
    i = pl.program_id(2)
    gt = pl.program_id(1) * tiles_per_split + i       # global row-tile index

    @pl.when(i == 0)
    def _():
        num_acc[...] = jnp.zeros_like(num_acc)
        den_acc[...] = jnp.zeros_like(den_acc)

    t = t_ref[0].astype(jnp.int32)                    # (r_tile, 128) labels

    # Channel max in the logits' native dtype (pixels on the 128-lane axis,
    # small class dim unrolled on the VPU); single f32 cast afterwards.
    m = x_ref[0, 0]
    for ch in range(1, num_classes):
        m = jnp.maximum(m, x_ref[0, ch])
    m = m.astype(jnp.float32)

    s = jnp.zeros((r_tile, 128), jnp.float32)     # sum_c exp(x_c - m)
    x_t = jnp.zeros((r_tile, 128), jnp.float32)   # logit of the target class
    w_t = jnp.zeros((r_tile, 128), jnp.float32)   # class weight of the target
    for ch in range(num_classes):
        xc = x_ref[0, ch].astype(jnp.float32)
        s = s + jnp.exp(xc - m)
        sel = t == ch
        x_t = jnp.where(sel, xc, x_t)
        w_t = jnp.where(sel, w_ref[ch], w_t)      # scalar class weight (SMEM)

    lse = jnp.log(s) + m
    loss = w_t * (lse - x_t)

    def accum(lv, wv):
        num_acc[...] += lv.reshape(groups, r_acc, 128).sum(axis=0)
        den_acc[...] += wv.reshape(groups, r_acc, 128).sum(axis=0)

    if needs_mask:
        # Only the last global row-tile contains Pallas-padded (garbage) rows;
        # all earlier tiles accumulate unmasked.  Keep the select a jnp.where
        # (never a multiply): padded lanes may hold Inf/NaN.
        @pl.when(gt < num_tiles - 1)
        def _():
            accum(loss, w_t)

        @pl.when(gt == num_tiles - 1)
        def _():
            row = jax.lax.broadcasted_iota(jnp.int32, (r_tile, 128), 0)
            valid = (gt * r_tile + row) < rows_true
            accum(jnp.where(valid, loss, 0.0), jnp.where(valid, w_t, 0.0))
    else:
        @pl.when(gt < num_tiles)   # skip clamped duplicate tiles of split 1
        def _():
            accum(loss, w_t)

    @pl.when(i == tiles_per_split - 1)
    def _():
        num_ref[...] = jnp.sum(num_acc[...]).reshape(1, 1, 1)
        den_ref[...] = jnp.sum(den_acc[...]).reshape(1, 1, 1)


def _weighted_ce_jax(y_pred, y_true, weight):
    """Fused pure-JAX weighted CE (tiny heads / H*W not a multiple of 128)."""
    c = y_pred.shape[1]
    logits = jnp.transpose(y_pred, (0, 2, 3, 1)).reshape(-1, c).astype(jnp.float32)
    tgt = y_true.reshape(-1).astype(jnp.int32)
    lse = jax.nn.logsumexp(logits, axis=-1)
    logit_t = jnp.take_along_axis(logits, tgt[:, None], axis=-1)[:, 0]
    w_t = weight[tgt]
    return jnp.sum(w_t * (lse - logit_t)) / jnp.sum(w_t)


def ce_loss_pallas(y_pred, y_true, class_weight, include_background=True,
                   max_block_bytes=4 * 1024 * 1024, min_pallas_bytes=1 << 20):
    """Weighted cross-entropy, mean reduction (PyTorch CrossEntropyLoss semantics).

    y_pred: (N, C, H, W) float logits (f32 or bf16)
    y_true: (N, 1, H, W) integer labels in [0, C)
    class_weight: (C,) float class weights
    """
    n, c, h, w = y_pred.shape
    hw = h * w
    itemsize = jnp.dtype(y_pred.dtype).itemsize

    weight = jnp.asarray(class_weight, jnp.float32)
    if not include_background:
        weight = weight.at[0].set(0.0)

    # Tiny deep-supervision heads: pallas_call launch overhead dwarfs the work.
    # Ragged H*W: avoid the full-HBM pad copy the kernel path would need.
    # TODO(synk): handle the <128-pixel ragged tail with an in-kernel epilogue
    # instead of falling back for the whole head.
    if hw == 0 or hw % 128 != 0 or n * c * hw * itemsize < min_pallas_bytes:
        return _weighted_ce_jax(y_pred, y_true, weight)

    rows = hw // 128

    # Labels as int8 when classes fit and the sublane extent respects the int8
    # (32,128) packing tile -> 4x less label HBM traffic in a mem-bound kernel.
    use_int8 = (c <= 127) and (rows % 32 == 0)
    t_dtype = jnp.int8 if use_int8 else jnp.int32
    row_mult = 32 if use_int8 else 8

    logits = y_pred.reshape(n, c, rows, 128)            # free, contiguous view
    targets = y_true.reshape(n, rows, 128).astype(t_dtype)

    # Biggest row-tile that fits the byte budget (amortizes the ~0.35us/step
    # fixed cost); bounded so the compiler-spilled f32 temporaries stay small
    # enough for v7x's 64 MiB/TC VMEM.
    cap_rows = max_block_bytes // (c * 128 * itemsize)
    cap_rows = min(cap_rows, 4096)
    cap_rows = max(row_mult, (cap_rows // row_mult) * row_mult)
    r_tile = rows if rows <= cap_rows else cap_rows
    num_tiles = pl.cdiv(rows, r_tile)
    needs_mask = num_tiles * r_tile != rows
    r_acc = 8 if r_tile % 8 == 0 else r_tile
    groups = r_tile // r_acc

    # Split the row-tile axis into two "parallel" halves so v7x's second
    # TensorCore has work even when N is small; partial sums per (batch, half).
    n_splits = 2 if num_tiles >= 2 else 1
    tiles_per_split = pl.cdiv(num_tiles, n_splits)

    def tile_idx(split, i):
        return jnp.minimum(split * tiles_per_split + i, num_tiles - 1)

    kernel = functools.partial(
        _ce_kernel, num_classes=c, r_tile=r_tile, r_acc=r_acc, groups=groups,
        num_tiles=num_tiles, tiles_per_split=tiles_per_split, rows_true=rows,
        needs_mask=needs_mask)

    # 2x double-buffered logits + targets blocks, accumulator scratch, and
    # headroom for the in-kernel f32 temporaries (m, s, x_t, w_t, loss, ...).
    vmem_bytes = (2 * c * r_tile * 128 * itemsize
                  + 2 * r_tile * 128 * jnp.dtype(t_dtype).itemsize
                  + 2 * r_acc * 128 * 4
                  + 8 * r_tile * 128 * 4)
    vmem_limit = int(min(max(32 * 1024 * 1024, int(vmem_bytes * 1.25)),
                         56 * 1024 * 1024))

    cost = pl.CostEstimate(
        flops=int(n * hw * (6 * c + 8)),
        transcendentals=int(n * hw * (c + 1)),
        bytes_accessed=int(logits.size * itemsize
                           + targets.size * jnp.dtype(t_dtype).itemsize
                           + weight.size * 4 + 2 * n * n_splits * 4),
    )

    # TODO(synk): try pipeline_mode=pl.Buffered(3) on the logits spec on v7x if
    # the trace still shows exposed DMA after the block-size bump.
    num, den = pl.pallas_call(
        kernel,
        out_shape=(
            jax.ShapeDtypeStruct((n * n_splits, 1, 1), jnp.float32),
            jax.ShapeDtypeStruct((n * n_splits, 1, 1), jnp.float32),
        ),
        grid=(n, n_splits, tiles_per_split),
        in_specs=[
            pl.BlockSpec(memory_space=pltpu.MemorySpace.SMEM),        # (C,) weights
            pl.BlockSpec((1, c, r_tile, 128),
                         lambda b, s, i: (b, 0, tile_idx(s, i), 0)),  # logits
            pl.BlockSpec((1, r_tile, 128),
                         lambda b, s, i: (b, tile_idx(s, i), 0)),     # labels
        ],
        out_specs=(
            pl.BlockSpec((1, 1, 1), lambda b, s, i: (b * n_splits + s, 0, 0)),
            pl.BlockSpec((1, 1, 1), lambda b, s, i: (b * n_splits + s, 0, 0)),
        ),
        scratch_shapes=[
            pltpu.VMEM((r_acc, 128), jnp.float32),
            pltpu.VMEM((r_acc, 128), jnp.float32),
        ],
        compiler_params=pltpu.CompilerParams(
            dimension_semantics=("parallel", "parallel", "arbitrary"),
            vmem_limit_bytes=vmem_limit,
        ),
        cost_estimate=cost,
    )(weight, logits, targets)

    return jnp.sum(num) / jnp.sum(den)


def multiple_output_loss_pallas(xs, ys, class_weight, weight_factors=None,
                                include_background=True,
                                min_pallas_bytes=1 << 20):
    """MultipleOutputLoss.forward: weights[0]*loss(x[0],y[0]) + sum_{i>0, w!=0} ..."""
    assert isinstance(xs, (tuple, list)), 'x must be either tuple or list'
    assert isinstance(ys, (tuple, list)), 'y must be either tuple or list'
    if weight_factors is None:
        weights = [1.0] * len(xs)
    else:
        weights = weight_factors
    total = weights[0] * ce_loss_pallas(xs[0], ys[0], class_weight,
                                        include_background,
                                        min_pallas_bytes=min_pallas_bytes)
    for i in range(1, len(xs)):
        if weights[i] != 0:
            total = total + weights[i] * ce_loss_pallas(
                xs[i], ys[i], class_weight, include_background,
                min_pallas_bytes=min_pallas_bytes)
    return total


# ------------------------- pure-JAX references -------------------------------

def _ce_loss_ref(y_pred, y_true, weight, include_background=True):
    weight = jnp.asarray(weight, jnp.float32)
    if not include_background:
        weight = weight.at[0].set(0.0)
    return _weighted_ce_jax(y_pred, y_true, weight)


def _multiple_output_loss_ref(xs, ys, class_weight, weight_factors=None,
                              include_background=True):
    if weight_factors is None:
        weights = [1.0] * len(xs)
    else:
        weights = weight_factors
    total = weights[0] * _ce_loss_ref(xs[0], ys[0], class_weight, include_background)
    for i in range(1, len(xs)):
        if weights[i] != 0:
            total = total + weights[i] * _ce_loss_ref(xs[i], ys[i], class_weight,
                                                      include_background)
    return total


if __name__ == "__main__":
    key = jax.random.PRNGKey(0)

    N, C = 2, 4
    spatial = [(16, 16), (8, 8), (4, 4)]      # deep-supervision heads
    weight_factors = [1.0, 0.5, 0.0]          # last head skipped (weight 0)

    xs, ys = [], []
    for (H, W) in spatial:
        key, k1, k2 = jax.random.split(key, 3)
        xs.append(jax.random.normal(k1, (N, C, H, W), dtype=jnp.float32))
        ys.append(jax.random.randint(k2, (N, 1, H, W), 0, C, dtype=jnp.int32))
    class_weight = jnp.linspace(0.5, 2.0, C, dtype=jnp.float32)

    ref = _multiple_output_loss_ref(xs, ys, class_weight, weight_factors, True)

    # (a) force the Pallas path on the heads with H*W % 128 == 0
    loss = multiple_output_loss_pallas(xs, ys, class_weight, weight_factors,
                                       include_background=True,
                                       min_pallas_bytes=0)
    loss = jax.block_until_ready(loss)
    assert jnp.allclose(loss, ref, rtol=1e-4, atol=1e-5), (loss, ref)

    # (b) default path: tiny heads use the fused pure-JAX fallback
    loss_d = jax.block_until_ready(
        multiple_output_loss_pallas(xs, ys, class_weight, weight_factors, True))
    assert jnp.allclose(loss_d, ref, rtol=1e-4, atol=1e-5), (loss_d, ref)

    # (c) int8-label path, single row-tile (64x64 -> rows = 32)
    key, k1, k2 = jax.random.split(key, 3)
    xb = jax.random.normal(k1, (2, C, 64, 64), dtype=jnp.float32)
    yb = jax.random.randint(k2, (2, 1, 64, 64), 0, C, dtype=jnp.int32)
    lb = jax.block_until_ready(
        ce_loss_pallas(xb, yb, class_weight, include_background=False,
                       min_pallas_bytes=0))
    rb = _ce_loss_ref(xb, yb, class_weight, include_background=False)
    assert jnp.allclose(lb, rb, rtol=1e-4, atol=1e-5), (lb, rb)

    # (d) bf16 logits on the same head (native-dtype channel max)
    lbf = jax.block_until_ready(
        ce_loss_pallas(xb.astype(jnp.bfloat16), yb, class_weight,
                       include_background=True, min_pallas_bytes=0))
    rbf = _ce_loss_ref(xb.astype(jnp.bfloat16), yb, class_weight, True)
    assert jnp.allclose(lbf, rbf, rtol=1e-3, atol=1e-3), (lbf, rbf)

    # (e) multi-tile + 2-way core split + odd tile count (clamped tail tile):
    #     128x96 -> rows = 96, forced r_tile = 32 -> num_tiles = 3
    key, k1, k2 = jax.random.split(key, 3)
    xe = jax.random.normal(k1, (2, C, 128, 96), dtype=jnp.float32)
    ye = jax.random.randint(k2, (2, 1, 128, 96), 0, C, dtype=jnp.int32)
    le = jax.block_until_ready(
        ce_loss_pallas(xe, ye, class_weight, include_background=True,
                       max_block_bytes=32 * C * 128 * 4, min_pallas_bytes=0))
    re = _ce_loss_ref(xe, ye, class_weight, True)
    assert jnp.allclose(le, re, rtol=1e-4, atol=1e-5), (le, re)

    # (f) ragged last row-tile (rows = 40, r_tile = 32): last-tile mask path
    key, k1, k2 = jax.random.split(key, 3)
    xf = jax.random.normal(k1, (2, C, 64, 80), dtype=jnp.float32)
    yf = jax.random.randint(k2, (2, 1, 64, 80), 0, C, dtype=jnp.int32)
    lf = jax.block_until_ready(
        ce_loss_pallas(xf, yf, class_weight, include_background=True,
                       max_block_bytes=32 * C * 128 * 4, min_pallas_bytes=0))
    rf = _ce_loss_ref(xf, yf, class_weight, True)
    assert jnp.allclose(lf, rf, rtol=1e-4, atol=1e-5), (lf, rf)

    print("KERNEL_OK")
</pallas_src>

<mosaic_0001>
module attributes {stable_mosaic.version = 11 : i64} {
  func.func @_ce_kernel(%arg0: i32, %arg1: i32, %arg2: i32, %arg3: memref<4xf32, #tpu.memory_space<smem>>, %arg4: memref<1x4x2x128xf32, #tpu.memory_space<vmem>>, %arg5: memref<1x2x128xi32, #tpu.memory_space<vmem>>, %arg6: memref<1x1x1xf32, #tpu.memory_space<vmem>>, %arg7: memref<1x1x1xf32, #tpu.memory_space<vmem>>, %arg8: memref<2x128xf32, #tpu.memory_space<vmem>>, %arg9: memref<2x128xf32, #tpu.memory_space<vmem>>) attributes {dimension_semantics = [#tpu.dimension_semantics<parallel>, #tpu.dimension_semantics<parallel>, #tpu.dimension_semantics<arbitrary>], iteration_bounds = array<i64: 2, 1, 1>, scalar_prefetch = 0 : i64, scratch_operands = 2 : i64, tpu.core_type = #tpu.core_type<tc>, window_params = [{transform_indices = @transform_0, window_bounds = array<i64: 4>}, {transform_indices = @transform_1, window_bounds = array<i64: 1, 4, 2, 128>}, {transform_indices = @transform_2, window_bounds = array<i64: 1, 2, 128>}, {transform_indices = @transform_3, window_bounds = array<i64: 1, 1, 1>}, {transform_indices = @transform_4, window_bounds = array<i64: 1, 1, 1>}]} {
    %c1_i32 = arith.constant 1 : i32
    %0 = arith.muli %arg1, %c1_i32 : i32
    %1 = arith.addi %0, %arg2 : i32
    %c0_i32 = arith.constant 0 : i32
    %2 = arith.cmpi eq, %arg2, %c0_i32 : i32
    %3 = arith.extui %2 : i1 to i32
    %c0_i32_0 = arith.constant 0 : i32
    %4 = arith.cmpi ne, %3, %c0_i32_0 : i32
    scf.if %4 {
      %cst_44 = arith.constant 0.000000e+00 : f32
      %75 = vector.broadcast %cst_44 : f32 to vector<2x128xf32>
      %c0_45 = arith.constant 0 : index
      %c0_46 = arith.constant 0 : index
      %76 = vector.load %arg8[%c0_45, %c0_46] : memref<2x128xf32, #tpu.memory_space<vmem>>, vector<2x128xf32>
      tpu.vector_store %arg8[%c0_45, %c0_46], %75 {strides = array<i32>} : memref<2x128xf32, #tpu.memory_space<vmem>>, vector<2x128xf32>,
      %cst_47 = arith.constant 0.000000e+00 : f32
      %77 = vector.broadcast %cst_47 : f32 to vector<2x128xf32>
      %c0_48 = arith.constant 0 : index
      %c0_49 = arith.constant 0 : index
      %78 = vector.load %arg9[%c0_48, %c0_49] : memref<2x128xf32, #tpu.memory_space<vmem>>, vector<2x128xf32>
      tpu.vector_store %arg9[%c0_48, %c0_49], %77 {strides = array<i32>} : memref<2x128xf32, #tpu.memory_space<vmem>>, vector<2x128xf32>,
    } else {
    }
    %c0 = arith.constant 0 : index
    %c0_1 = arith.constant 0 : index
    %c0_2 = arith.constant 0 : index
    %5 = vector.load %arg5[%c0, %c0_1, %c0_2] : memref<1x2x128xi32, #tpu.memory_space<vmem>>, vector<1x2x128xi32>
    %6 = vector.shape_cast %5 : vector<1x2x128xi32> to vector<2x128xi32>
    %c0_3 = arith.constant 0 : index
    %c0_4 = arith.constant 0 : index
    %c0_5 = arith.constant 0 : index
    %c0_6 = arith.constant 0 : index
    %7 = vector.load %arg4[%c0_3, %c0_4, %c0_5, %c0_6] : memref<1x4x2x128xf32, #tpu.memory_space<vmem>>, vector<1x1x2x128xf32>
    %8 = vector.shape_cast %7 : vector<1x1x2x128xf32> to vector<2x128xf32>
    %c0_7 = arith.constant 0 : index
    %c1 = arith.constant 1 : index
    %c0_8 = arith.constant 0 : index
    %c0_9 = arith.constant 0 : index
    %9 = vector.load %arg4[%c0_7, %c1, %c0_8, %c0_9] : memref<1x4x2x128xf32, #tpu.memory_space<vmem>>, vector<1x1x2x128xf32>
    %10 = vector.shape_cast %9 : vector<1x1x2x128xf32> to vector<2x128xf32>
    %11 = arith.maximumf %8, %10 : vector<2x128xf32>
    %c0_10 = arith.constant 0 : index
    %c2 = arith.constant 2 : index
    %c0_11 = arith.constant 0 : index
    %c0_12 = arith.constant 0 : index
    %12 = vector.load %arg4[%c0_10, %c2, %c0_11, %c0_12] : memref<1x4x2x128xf32, #tpu.memory_space<vmem>>, vector<1x1x2x128xf32>
    %13 = vector.shape_cast %12 : vector<1x1x2x128xf32> to vector<2x128xf32>
    %14 = arith.maximumf %11, %13 : vector<2x128xf32>
    %c0_13 = arith.constant 0 : index
    %c3 = arith.constant 3 : index
    %c0_14 = arith.constant 0 : index
    %c0_15 = arith.constant 0 : index
    %15 = vector.load %arg4[%c0_13, %c3, %c0_14, %c0_15] : memref<1x4x2x128xf32, #tpu.memory_space<vmem>>, vector<1x1x2x128xf32>
    %16 = vector.shape_cast %15 : vector<1x1x2x128xf32> to vector<2x128xf32>
    %17 = arith.maximumf %14, %16 : vector<2x128xf32>
    %cst = arith.constant 0.000000e+00 : f32
    %18 = vector.broadcast %cst : f32 to vector<2x128xf32>
    %cst_16 = arith.constant 0.000000e+00 : f32
    %19 = vector.broadcast %cst_16 : f32 to vector<2x128xf32>
    %cst_17 = arith.constant 0.000000e+00 : f32
    %20 = vector.broadcast %cst_17 : f32 to vector<2x128xf32>
    %c0_18 = arith.constant 0 : index
    %c0_19 = arith.constant 0 : index
    %c0_20 = arith.constant 0 : index
    %c0_21 = arith.constant 0 : index
    %21 = vector.load %arg4[%c0_18, %c0_19, %c0_20, %c0_21] : memref<1x4x2x128xf32, #tpu.memory_space<vmem>>, vector<1x1x2x128xf32>
    %22 = vector.shape_cast %21 : vector<1x1x2x128xf32> to vector<2x128xf32>
    %23 = arith.subf %22, %17 : vector<2x128xf32>
    %24 = math.exp %23 : vector<2x128xf32>
    %25 = arith.addf %18, %24 : vector<2x128xf32>
    %c0_i32_22 = arith.constant 0 : i32
    %26 = vector.broadcast %c0_i32_22 : i32 to vector<2x128xi32>
    %27 = arith.cmpi eq, %6, %26 : vector<2x128xi32>
    %28 = arith.select %27, %22, %19 : vector<2x128xi1>, vector<2x128xf32>
    %c0_23 = arith.constant 0 : index
    %29 = memref.load %arg3[%c0_23] : memref<4xf32, #tpu.memory_space<smem>>
    %30 = vector.broadcast %29 : f32 to vector<2x128xf32>
    %31 = arith.select %27, %30, %20 : vector<2x128xi1>, vector<2x128xf32>
    %c0_24 = arith.constant 0 : index
    %c1_25 = arith.constant 1 : index
    %c0_26 = arith.constant 0 : index
    %c0_27 = arith.constant 0 : index
    %32 = vector.load %arg4[%c0_24, %c1_25, %c0_26, %c0_27] : memref<1x4x2x128xf32, #tpu.memory_space<vmem>>, vector<1x1x2x128xf32>
    %33 = vector.shape_cast %32 : vector<1x1x2x128xf32> to vector<2x128xf32>
    %34 = arith.subf %33, %17 : vector<2x128xf32>
    %35 = math.exp %34 : vector<2x128xf32>
    %36 = arith.addf %25, %35 : vector<2x128xf32>
    %c1_i32_28 = arith.constant 1 : i32
    %37 = vector.broadcast %c1_i32_28 : i32 to vector<2x128xi32>
    %38 = arith.cmpi eq, %6, %37 : vector<2x128xi32>
    %39 = arith.select %38, %33, %28 : vector<2x128xi1>, vector<2x128xf32>
    %c1_29 = arith.constant 1 : index
    %40 = memref.load %arg3[%c1_29] : memref<4xf32, #tpu.memory_space<smem>>
    %41 = vector.broadcast %40 : f32 to vector<2x128xf32>
    %42 = arith.select %38, %41, %31 : vector<2x128xi1>, vector<2x128xf32>
    %c0_30 = arith.constant 0 : index
    %c2_31 = arith.constant 2 : index
    %c0_32 = arith.constant 0 : index
    %c0_33 = arith.constant 0 : index
    %43 = vector.load %arg4[%c0_30, %c2_31, %c0_32, %c0_33] : memref<1x4x2x128xf32, #tpu.memory_space<vmem>>, vector<1x1x2x128xf32>
    %44 = vector.shape_cast %43 : vector<1x1x2x128xf32> to vector<2x128xf32>
    %45 = arith.subf %44, %17 : vector<2x128xf32>
    %46 = math.exp %45 : vector<2x128xf32>
    %47 = arith.addf %36, %46 : vector<2x128xf32>
    %c2_i32 = arith.constant 2 : i32
    %48 = vector.broadcast %c2_i32 : i32 to vector<2x128xi32>
    %49 = arith.cmpi eq, %6, %48 : vector<2x128xi32>
    %50 = arith.select %49, %44, %39 : vector<2x128xi1>, vector<2x128xf32>
    %c2_34 = arith.constant 2 : index
    %51 = memref.load %arg3[%c2_34] : memref<4xf32, #tpu.memory_space<smem>>
    %52 = vector.broadcast %51 : f32 to vector<2x128xf32>
    %53 = arith.select %49, %52, %42 : vector<2x128xi1>, vector<2x128xf32>
    %c0_35 = arith.constant 0 : index
    %c3_36 = arith.constant 3 : index
    %c0_37 = arith.constant 0 : index
    %c0_38 = arith.constant 0 : index
    %54 = vector.load %arg4[%c0_35, %c3_36, %c0_37, %c0_38] : memref<1x4x2x128xf32, #tpu.memory_space<vmem>>, vector<1x1x2x128xf32>
    %55 = vector.shape_cast %54 : vector<1x1x2x128xf32> to vector<2x128xf32>
    %56 = arith.subf %55, %17 : vector<2x128xf32>
    %57 = math.exp %56 : vector<2x128xf32>
    %58 = arith.addf %47, %57 : vector<2x128xf32>
    %c3_i32 = arith.constant 3 : i32
    %59 = vector.broadcast %c3_i32 : i32 to vector<2x128xi32>
    %60 = arith.cmpi eq, %6, %59 : vector<2x128xi32>
    %61 = arith.select %60, %55, %50 : vector<2x128xi1>, vector<2x128xf32>
    %c3_39 = arith.constant 3 : index
    %62 = memref.load %arg3[%c3_39] : memref<4xf32, #tpu.memory_space<smem>>
    %63 = vector.broadcast %62 : f32 to vector<2x128xf32>
    %64 = arith.select %60, %63, %53 : vector<2x128xi1>, vector<2x128xf32>
    %65 = math.log %58 : vector<2x128xf32>
    %66 = arith.addf %65, %17 : vector<2x128xf32>
    %67 = arith.subf %66, %61 : vector<2x128xf32>
    %68 = arith.mulf %64, %67 : vector<2x128xf32>
    %c1_i32_40 = arith.constant 1 : i32
    %69 = arith.cmpi slt, %1, %c1_i32_40 : i32
    %70 = arith.extui %69 : i1 to i32
    %c0_i32_41 = arith.constant 0 : i32
    %71 = arith.cmpi ne, %70, %c0_i32_41 : i32
    scf.if %71 {
      %c0_44 = arith.constant 0 : index
      %c0_45 = arith.constant 0 : index
      %75 = vector.load %arg8[%c0_44, %c0_45] : memref<2x128xf32, #tpu.memory_space<vmem>>, vector<2x128xf32>
      %76 = vector.shape_cast %68 : vector<2x128xf32> to vector<1x2x128xf32>
      %cst_46 = arith.constant dense<0.000000e+00> : vector<2x128xf32>
      %77 = vector.multi_reduction <add>, %76, %cst_46 [0] : vector<1x2x128xf32> to vector<2x128xf32>
      %78 = arith.addf %75, %77 : vector<2x128xf32>
      %c0_47 = arith.constant 0 : index
      %c0_48 = arith.constant 0 : index
      %79 = vector.load %arg8[%c0_47, %c0_48] : memref<2x128xf32, #tpu.memory_space<vmem>>, vector<2x128xf32>
      tpu.vector_store %arg8[%c0_47, %c0_48], %78 {strides = array<i32>} : memref<2x128xf32, #tpu.memory_space<vmem>>, vector<2x128xf32>,
      %c0_49 = arith.constant 0 : index
      %c0_50 = arith.constant 0 : index
      %80 = vector.load %arg9[%c0_49, %c0_50] : memref<2x128xf32, #tpu.memory_space<vmem>>, vector<2x128xf32>
      %81 = vector.shape_cast %64 : vector<2x128xf32> to vector<1x2x128xf32>
      %cst_51 = arith.constant dense<0.000000e+00> : vector<2x128xf32>
      %82 = vector.multi_reduction <add>, %81, %cst_51 [0] : vector<1x2x128xf32> to vector<2x128xf32>
      %83 = arith.addf %80, %82 : vector<2x128xf32>
      %c0_52 = arith.constant 0 : index
      %c0_53 = arith.constant 0 : index
      %84 = vector.load %arg9[%c0_52, %c0_53] : memref<2x128xf32, #tpu.memory_space<vmem>>, vector<2x128xf32>
      tpu.vector_store %arg9[%c0_52, %c0_53], %83 {strides = array<i32>} : memref<2x128xf32, #tpu.memory_space<vmem>>, vector<2x128xf32>,
    } else {
    }
    %c0_i32_42 = arith.constant 0 : i32
    %72 = arith.cmpi eq, %arg2, %c0_i32_42 : i32
    %73 = arith.extui %72 : i1 to i32
    %c0_i32_43 = arith.constant 0 : i32
    %74 = arith.cmpi ne, %73, %c0_i32_43 : i32
    scf.if %74 {
      %c0_44 = arith.constant 0 : index
      %c0_45 = arith.constant 0 : index
      %75 = vector.load %arg8[%c0_44, %c0_45] : memref<2x128xf32, #tpu.memory_space<vmem>>, vector<2x128xf32>
      %76 = vector.shape_cast %75 : vector<2x128xf32> to vector<1x2x128xf32>
      %cst_46 = arith.constant dense<0.000000e+00> : vector<1xf32>
      %77 = vector.multi_reduction <add>, %76, %cst_46 [1, 2] : vector<1x2x128xf32> to vector<1xf32>
      %78 = vector.shape_cast %77 : vector<1xf32> to vector<1x1x1xf32>
      %79 = vector.extract %78[0, 0, 0] : f32 from vector<1x1x1xf32>
      %80 = vector.broadcast %79 : f32 to vector<1x1x1xf32>
      %c0_47 = arith.constant 0 : index
      %c0_48 = arith.constant 0 : index
      %c0_49 = arith.constant 0 : index
      %81 = vector.load %arg6[%c0_47, %c0_48, %c0_49] : memref<1x1x1xf32, #tpu.memory_space<vmem>>, vector<1x1x1xf32>
      tpu.vector_store %arg6[%c0_47, %c0_48, %c0_49], %80 {strides = array<i32>} : memref<1x1x1xf32, #tpu.memory_space<vmem>>, vector<1x1x1xf32>,
      %c0_50 = arith.constant 0 : index
      %c0_51 = arith.constant 0 : index
      %82 = vector.load %arg9[%c0_50, %c0_51] : memref<2x128xf32, #tpu.memory_space<vmem>>, vector<2x128xf32>
      %83 = vector.shape_cast %82 : vector<2x128xf32> to vector<1x2x128xf32>
      %cst_52 = arith.constant dense<0.000000e+00> : vector<1xf32>
      %84 = vector.multi_reduction <add>, %83, %cst_52 [1, 2] : vector<1x2x128xf32> to vector<1xf32>
      %85 = vector.shape_cast %84 : vector<1xf32> to vector<1x1x1xf32>
      %86 = vector.extract %85[0, 0, 0] : f32 from vector<1x1x1xf32>
      %87 = vector.broadcast %86 : f32 to vector<1x1x1xf32>
      %c0_53 = arith.constant 0 : index
      %c0_54 = arith.constant 0 : index
      %c0_55 = arith.constant 0 : index
      %88 = vector.load %arg7[%c0_53, %c0_54, %c0_55] : memref<1x1x1xf32, #tpu.memory_space<vmem>>, vector<1x1x1xf32>
      tpu.vector_store %arg7[%c0_53, %c0_54, %c0_55], %87 {strides = array<i32>} : memref<1x1x1xf32, #tpu.memory_space<vmem>>, vector<1x1x1xf32>,
    } else {
    }
    return
  }
  func.func @transform_0(%arg0: i32, %arg1: i32, %arg2: i32) -> i32 {
    %c0_i32 = arith.constant 0 : i32
    %c0_i32_0 = arith.constant 0 : i32
    return %c0_i32 : i32
  }
  func.func @transform_1(%arg0: i32, %arg1: i32, %arg2: i32) -> (i32, i32, i32, i32) {
    %c1_i32 = arith.constant 1 : i32
    %0 = arith.muli %arg1, %c1_i32 : i32
    %1 = arith.addi %0, %arg2 : i32
    %c0_i32 = arith.constant 0 : i32
    %2 = arith.minsi %1, %c0_i32 : i32
    %c0_i32_0 = arith.constant 0 : i32
    %c0_i32_1 = arith.constant 0 : i32
    %c0_i32_2 = arith.constant 0 : i32
    return %arg0, %c0_i32_0, %2, %c0_i32_1 : i32, i32, i32, i32
  }
  func.func @transform_2(%arg0: i32, %arg1: i32, %arg2: i32) -> (i32, i32, i32) {
    %c1_i32 = arith.constant 1 : i32
    %0 = arith.muli %arg1, %c1_i32 : i32
    %1 = arith.addi %0, %arg2 : i32
    %c0_i32 = arith.constant 0 : i32
    %2 = arith.minsi %1, %c0_i32 : i32
    %c0_i32_0 = arith.constant 0 : i32
    %c0_i32_1 = arith.constant 0 : i32
    return %arg0, %2, %c0_i32_0 : i32, i32, i32
  }
  func.func @transform_3(%arg0: i32, %arg1: i32, %arg2: i32) -> (i32, i32, i32) {
    %c1_i32 = arith.constant 1 : i32
    %0 = arith.muli %arg0, %c1_i32 : i32
    %1 = arith.addi %0, %arg1 : i32
    %c0_i32 = arith.constant 0 : i32
    %c0_i32_0 = arith.constant 0 : i32
    %c0_i32_1 = arith.constant 0 : i32
    return %1, %c0_i32, %c0_i32_0 : i32, i32, i32
  }
  func.func @transform_4(%arg0: i32, %arg1: i32, %arg2: i32) -> (i32, i32, i32) {
    %c1_i32 = arith.constant 1 : i32
    %0 = arith.muli %arg0, %c1_i32 : i32
    %1 = arith.addi %0, %arg1 : i32
    %c0_i32 = arith.constant 0 : i32
    %c0_i32_0 = arith.constant 0 : i32
    %c0_i32_1 = arith.constant 0 : i32
    return %1, %c0_i32, %c0_i32_0 : i32, i32, i32
  }
}

</mosaic_0001>

<bundles_post_ra>
// kernel: tpu_custom_call.1
= control target key start
LH: loop header
LB: loop body
LE: loop exit
PB: predicated region body
PF: predicated region fallthrough
CT: control target
= control target key end

     0   :  { %s987_s0 = inlined_call_operand.hbm [shape: f32[4], index: 0, kind: input, shape index: {}]   ;;  %s988_s1 = inlined_call_operand.hbm [shape: f32[2,4,2,128], index: 1, kind: input, shape index: {}]   ;;  %s989_s2 = inlined_call_operand.hbm [shape: s32[2,2,128], index: 2, kind: input, shape index: {}]   ;;  %s990_s3 = inlined_call_operand.vmem [shape: f32[2,1,1], index: 3, kind: output, shape index: {0}]   ;;  %s991_s4 = inlined_call_operand.vmem [shape: f32[2,1,1], index: 4, kind: output, shape index: {1}]  }
   0x1   :  { %992 = sst [smem:[#allocation13_spill]] %s987_s0 }
   0x2   :  { %993 = sst [smem:[#allocation14_spill]] %s988_s1 }
   0x3   :  { %10 = vsyncpa [#allocation6], 0 }
   0x4   :  { %11 = vsyncpa [#allocation5], 0 }
   0x5   :  { %13 = vsyncpa [#allocation5 + $0x1], 0 }
   0x6   :  { %14 = vsyncpa [#allocation9], 0 }
   0x7   :  { %16 = vsyncpa [#allocation9 + $0x1], 0  ;;  %s841_s15 = smov 0   ;;  %s843_s16 = smov 0  }
   0x8   :  { %s845_s17 = smov 0   ;;  %s847_s18 = smov 0  }
   0x9   :  { %s849_s19 = smov 0   ;;  %s851_s20 = smov 0  }
   0xa LB: > { %s572_s21 = sadd.s32 4294967295, %s808_s20   ;;  %s77_s22 = sadd.s32 1, %s796_s17  ;;  %s808_s20 = sphi %s851_s20, %s22_s20   ;;  %s804_s19 = sphi %s849_s19, %s1004_s19   ;;  %s800_s18 = sphi %s847_s18, %s1003_s18   ;;  %s796_s17 = sphi %s845_s17, %s1002_s17   ;;  %s792_s16 = sphi %s843_s16, %s1001_s16   ;;  %s788_s15 = sphi %s841_s15, %s1000_s15  }
   0xb   : > { %p84_p0 = scmp.ne.s32.totalorder %s796_s17, %s792_s16  ;;  %p85_p1 = scmp.eq.s32.totalorder %s808_s20, 0 }
   0xc   : > { %p90_p2 = scmp.ne.s32.totalorder %s792_s16, %s788_s15  ;;  %p875_p3 = scmp.eq.s32.totalorder %s572_s21, 0 }
   0xd   : > { %p86_p4 = por %p85_p1, %p84_p0  ;;  %p574_p5 = scmp.ge.s32.totalorder %s808_s20, 1 }
   0xe   : > { %p882_p6 = por %p875_p3, %p90_p2  ;;  %p191_p7 = scmp.lt.s32.totalorder %s808_s20, 3 }
   0xf   : > { %p619_p9 = scmp.lt.s32.totalorder %s808_s20, 2  ;;  %s41_s27 = sadd.s32 1, %s804_s19 }
  0x10   : > { %p887_p8 = pnand %p574_p5, %p191_p7  ;;  %p43_p13 = scmp.ge.s32.totalorder %s41_s27, 2 }
  0x11   : > { %p894_p11 = pnand %p619_p9, %p86_p4  ;;  %s902_s28 = sand.u32 1, %s796_s17  }
  0x12   : > { %p607_p10 = pneg %p887_p8  ;;  %s810_s29 = smov [#allocation4]  }
  0x13   : > { %s998_s0 = sld [smem:[#allocation13_spill]]  ;;  %s1006_s27 = smov (%p43_p13, %s41_s27), 0 }
  0x14   : > { %p608_p12 = pnand %p607_p10, %p875_p3  ;;  %s577_s6 = sshll.u32 %s902_s28, 3 }
  0x15   : > { %s594_s7 = sshll.u32 %s804_s19, 7  ;;  %s72_s8 = ssub.s32 %s804_s19, %s1006_s27 }
  0x16   : > { %p75_p0 = scmp.eq.s32.totalorder %s72_s8, 0  ;;  %s999_s1 = sld [smem:[#allocation14_spill]] }
  0x17   : > { %s217_s12 = scalar_lea.vmem [#allocation7], %s577_s6  ;;  %s214_s15 = scalar_lea.sflag [#allocation5], %s902_s28 }
  0x18   : > { %s228_s13 = sshll.u32 %s217_s12, 4  ;;  %p696_p1 = pneg %p894_p11  ;;  %s229_s13 = int_to_ptr.vmem [resolvable:$true] %s228_s13 }
  0x19   : > { %610 = dma.hbm_to_smem (!%p608_p12), %s998_s0, 16, %s810_s29, [#allocation6]  }
  0x1a   : > { %s917_s14 = scalar_select %p75_p0, %s796_s17, %s77_s22  }
  0x1b   : > { %s707_s21 = scalar_lea.vmem %s229_s13, 128  ;;  %s811_s29 = smov [#allocation7]  }
  0x1c   : > { %s227_s11 = scalar_lea.hbm %s999_s1, %s594_s7  ;;  %p708_p2 = scmp.ne.s32.totalorder %s229_s13, %s707_s21 }
  0x1d   : > { %s712_s30 = sshll.u32 %s811_s29, 4  ;;  %s713_s30 = int_to_ptr.vmem [resolvable:$false] %s712_s30 }
  0x1e   : > { %p710_p4 = pnand %p708_p2, %p696_p1  ;;  %s714_s5 = scalar_lea.vmem %s713_s30, 256 }
  0x1f   : > { %p715_p7 = scmp.lt.s32.totalorder %s229_s13, %s713_s30  ;;  %p716_p9 = scmp.lt.s32.totalorder %s714_s5, %s707_s21 }
  0x20   : > { %p711_p5 = pneg %p710_p4 }
  0x21   : > { %p717_p10 = por %p716_p9, %p715_p7 }
  0x23   : > { %p718_p12 = pnand %p717_p10, %p711_p5 }
  0x25   : > { %721 = shalt.err (!%p718_p12)
}
  0x26   : > { %s812_s22 = smov 32   ;;  %s813_s6 = smov 2  }
  0x27   : > { %614 = dma.hbm_to_vmem [thread:$0]  (!%p894_p11), %s227_s11, 128, %s229_s13, %s214_s15, %s812_s22, %s812_s22, %s813_s6  }
  0x28   : > { %s580_s7 = sshll.u32 %s902_s28, 1  ;;  %s581_s8 = sshll.u32 %s804_s19, 5 }
  0x29   : > { %s251_s12 = scalar_lea.hbm %s989_s2, %s581_s8  ;;  %s242_s29 = scalar_lea.vmem [#allocation8], %s580_s7 }
  0x2a   : > { %s253_s21 = sshll.u32 %s242_s29, 4  ;;  %s239_s30 = scalar_lea.sflag [#allocation9], %s902_s28  ;;  %s254_s21 = int_to_ptr.vmem [resolvable:$true] %s253_s21 }
  0x2b   : > { %s735_s5 = scalar_lea.vmem %s254_s21, 32  ;;  %s814_s0 = smov [#allocation8]  }
  0x2c   : > { %p736_p13 = scmp.ne.s32.totalorder %s254_s21, %s735_s5  ;;  %s740_s1 = sshll.u32 %s814_s0, 4  ;;  %s741_s1 = int_to_ptr.vmem [resolvable:$false] %s740_s1 }
  0x2d   : > { %s742_s11 = scalar_lea.vmem %s741_s1, 64  ;;  %p743_p4 = scmp.lt.s32.totalorder %s254_s21, %s741_s1 }
  0x2e   : > { %p738_p0 = pnand %p736_p13, %p696_p1  ;;  %p744_p5 = scmp.lt.s32.totalorder %s742_s11, %s735_s5 }
  0x30   : > { %p739_p2 = pneg %p738_p0  ;;  %p745_p7 = por %p744_p5, %p743_p4 }
  0x32   : > { %p746_p9 = pnand %p745_p7, %p739_p2 }
  0x34   : > { %749 = shalt.err (!%p746_p9)
}
  0x35   : > { %617 = dma.hbm_to_vmem [thread:$0]  (!%p894_p11), %s251_s12, 32, %s254_s21, %s239_s30  }
  0x36   : > { %262 = sbr.rel (%p887_p8) target bundleno = 340 (0x154), region = 32 }
  0x3b   : > { %775 = dma.done.wait (%p875_p3), [#allocation6], 16  }
  0x3c   : > { %777 = vsyncadd (%p875_p3), [#allocation6], 4294967280  ;;  %s268_s0 = sand.u32 1, %s792_s16  }
  0x3d   : > { %s584_s1 = sshll.u32 %s268_s0, 3  ;;  %s269_s28 = scalar_lea.sflag [#allocation5], %s268_s0 }
  0x3e   : > { %s272_s13 = scalar_lea.vmem [#allocation7], %s584_s1 }
  0x3f   : > { %779 = dma.done.wait (%p882_p6), %s269_s28, 128  }
  0x40   : > { %781 = vsyncadd (%p882_p6), %s269_s28, 4294967168  ;;  %s585_s25 = sshll.u32 %s268_s0, 1  ;;  %s278_s26 = scalar_lea.sflag [#allocation9], %s268_s0 }
  0x41   : > { %s281_s15 = scalar_lea.vmem [#allocation8], %s585_s25 }
  0x42   : > { %783 = dma.done.wait (%p882_p6), %s278_s26, 32  }
  0x43   : > { %785 = vsyncadd (%p882_p6), %s278_s26, 4294967264 }
  0x44   : > { %286 = sfence }
  0x45   : > { %v339_v0 = vld [vmem:[%s272_s13] sm:$0x3]  ;;  %v815_v1 = vmov 0.0   ;;  %v586_v2 = vld [vmem:[%s272_s13 + $0x2] sm:$0x3]  ;;  %s355_s23 = sld [smem:[#allocation4]] }
  0x46   : > { %336 = vst [vmem:[#allocation2] sm:$0x3] %v815_v1  ;;  %v587_v3 = vld [vmem:[%s272_s13 + $0x4] sm:$0x3]  ;;  %337 = vst [vmem:[#allocation3] sm:$0x3] %v815_v1  ;;  %v342_v4 = vmax.f32 %v339_v0, %v586_v2 }
  0x47   : > { %v588_v5 = vld [vmem:[%s272_s13 + $0x6] sm:$0x3]  ;;  %s589_s22 = sld [smem:[#allocation4 + $0x1]]  ;;  %v338_v6 = vld [vmem:[%s281_s15] sm:$0x3]  ;;  %vm406_vm4 = vcmask 1041408  }
  0x48   : > { %v345_v7 = vmax.f32 %v342_v4, %v587_v3  ;;  %s590_s6 = sld [smem:[#allocation4 + $0x2]]  ;;  %vm353_vm0 = vcmp.eq.s32.totalorder %v338_v6, 0  ;;  %vm362_vm1 = vcmp.eq.s32.totalorder %v338_v6, 1  ;;  %vm371_vm2 = vcmp.eq.s32.totalorder %v338_v6, 2  ;;  %p322_p3 = scmp.lt.s32.totalorder %s800_s18, 1 }
  0x49   : > { %s591_s7 = sld [smem:[#allocation4 + $0x3]]  ;;  %vm380_vm3 = vcmp.eq.s32.totalorder %v338_v6, 3  ;;  %v354_v34 = vsel %vm353_vm0, %v339_v0, 0.0  ;;  %vm418_vm5 = vcmask 0  }
  0x4a   : > { %v348_v8 = vmax.f32 %v345_v7, %v588_v5  ;;  %v363_v35 = vsel %vm362_vm1, %v586_v2, %v354_v34  ;;  %s1008_s18 = smov (!%p322_p3, %s800_s18), 1 }
  0x4b   : > { %v356_v10 = vstv %s355_s23  ;;  %v372_v36 = vsel %vm371_vm2, %v587_v3, %v363_v35  ;;  %s324_s9 = scalar_lea.vmem %s990_s3, %s1008_s18  ;;  %s329_s21 = scalar_lea.vmem %s991_s4, %s1008_s18 }
  0x4c   : > { %v349_v9 = vsub.f32 %v339_v0, %v348_v8  ;;  %v358_v11 = vsub.f32 %v586_v2, %v348_v8  ;;  %v367_v12 = vsub.f32 %v587_v3, %v348_v8  ;;  %v357_v13 = vsel %vm353_vm0, %v356_v10, 0.0 }
  0x4d   : > { %v365_v14 = vstv %s589_s22  ;;  %v376_v15 = vsub.f32 %v588_v5, %v348_v8  ;;  %v398_v23 = vld [vmem:[#allocation3] sm:$0x3]  ;;  %v381_v39 = vsel %vm380_vm3, %v588_v5, %v372_v36  ;;  %v394_v42 = vld [vmem:[#allocation2] sm:$0x3] }
  0x4e   : > { %v350_v16 = vmul.f32 1.442695, %v349_v9  ;;  %v359_v17 = vmul.f32 1.442695, %v358_v11  ;;  %v366_v18 = vsel %vm362_vm1, %v365_v14, %v357_v13  ;;  %v368_v19 = vmul.f32 1.442695, %v367_v12 }
  0x4f   : > { %v374_v20 = vstv %s590_s6  ;;  %v377_v21 = vmul.f32 1.442695, %v376_v15  ;;  %v383_v22 = vstv %s591_s7 }
  0x50   : > { %673 = vpow2.f32 %v350_v16  ;;  %v375_v24 = vsel %vm371_vm2, %v374_v20, %v366_v18 }
  0x51   : > { %675 = vpow2.f32 %v359_v17  ;;  %v384_v25 = vsel %vm380_vm3, %v383_v22, %v375_v24 }
  0x52   : > { %677 = vpow2.f32 %v368_v19  ;;  %v400_v26 = vadd.f32 %v398_v23, %v384_v25 }
  0x53   : > { %679 = vpow2.f32 %v377_v21 }
  0x54   : > { %401 = vst [vmem:[#allocation3] sm:$0x3] %v400_v26 }
  0x5b   : > { %v420_v46 = vld [vmem:[#allocation3] sm:$0x3] }
  0x5c   : > { %v421_v48 = vsel %vm406_vm4, %v420_v46, 0.0 }
  0x5d   : > { %v674_v27 = vpop.eup %673 }
  0x5e   : > { %v676_v28 = vpop.eup %675 }
  0x5f   : > { %v678_v29 = vpop.eup %677  ;;  %v361_v30 = vadd.f32 %v676_v28, %v674_v27 }
  0x60   : > { %v680_v31 = vpop.eup %679 }
  0x61   : > { %v370_v32 = vadd.f32 %v678_v29, %v361_v30 }
  0x63   : > { %v379_v33 = vadd.f32 %v680_v31, %v370_v32 }
  0x65   : > { %681 = vlog2.f32 %v379_v33 }
  0x72   : > { %v682_v37 = vpop.eup %681 }
  0x73   : > { %v386_v38 = vmul.f32 0.6931472, %v682_v37 }
  0x75   : > { %v387_v40 = vadd.f32 %v386_v38, %v348_v8 }
  0x77   : > { %v388_v41 = vsub.f32 %v387_v40, %v381_v39 }
  0x79   : > { %v389_v43 = vmul.f32 %v388_v41, %v384_v25 }
  0x7b   : > { %v396_v44 = vadd.f32 %v394_v42, %v389_v43 }
  0x7d   : > { %397 = vst [vmem:[#allocation2] sm:$0x3] %v396_v44 }
  0x84   : > { %v405_v45 = vld [vmem:[#allocation2] sm:$0x3] }
  0x85   : > { %v407_v47 = vsel %vm406_vm4, %v405_v45, 0.0 }
  0x86   : > { %408 = vadd.xlane.f32.xlu0 %v407_v47 }
  0x8a   : > { %422 = vadd.xlane.f32.xlu0 %v421_v48 }
 0x10f   : > { %v409_v49 = vpop.xlane.xlu0 %408 }
 0x110   : > { %v410_v50 = vrot.slane %v409_v49, 4 }
 0x112   : > { %v411_v51 = vadd.f32 %v410_v50, %v409_v49 }
 0x113   : > { %v423_v52 = vpop.xlane.xlu0 %422 }
 0x114   : > { %v412_v53 = vrot.slane %v411_v51, 2  ;;  %v424_v54 = vrot.slane %v423_v52, 4 }
 0x116   : > { %v425_v55 = vadd.f32 %v424_v54, %v423_v52  ;;  %v413_v56 = vadd.f32 %v412_v53, %v411_v51 }
 0x118   : > { %v426_v57 = vrot.slane %v425_v55, 2  ;;  %v414_v58 = vrot.slane %v413_v56, 1 }
 0x11a   : > { %v427_v59 = vadd.f32 %v426_v57, %v425_v55  ;;  %v415_v60 = vadd.f32 %v414_v58, %v413_v56 }
 0x11c   : > { %595 = vpush %v415_v60  ;;  %v428_v61 = vrot.slane %v427_v59, 1 }
 0x11e   : > { %v429_v62 = vadd.f32 %v428_v61, %v427_v59 }
 0x120   : > { %597 = vpush %v429_v62 }
 0x14d   : > { %s596_s10 = spop %595 }
 0x14e   : > { %v417_v63 = vstv %s596_s10 }
 0x14f   : > { %419 = vst.msk [vmem:[%s324_s9] sm:$0x1] %vm418_vm5, %v417_v63 }
 0x151   : > { %s598_s30 = spop %597 }
 0x152   : > { %v431_v0 = vstv %s598_s30 }
 0x153   : > { %432 = vst.msk [vmem:[%s329_s21] sm:$0x1] %vm418_vm5, %v431_v0 }
 0x154 PF: > { %s22_s20 = sadd.s32 1, %s808_s20   ;;  %s1000_s15 = smov %s792_s16 }
 0x155   : > { %p19_p6 = scmp.ge.s32.totalorder %s22_s20, 4   ;;  %s1001_s16 = smov %s796_s17 }
 0x156   : > { %s1002_s17 = smov %s917_s14  ;;  %s1003_s18 = smov %s804_s19 }
 0x157   : > { %s1004_s19 = smov %s1006_s27  ;;  %21 = sbr.rel (!%p19_p6) target bundleno = 10 (0xa), region = 117 }
 0x15c   :  { %468 = vsyncpa [#allocation5], 1 }
 0x15d   :  { %470 = vsyncpa [#allocation5 + $0x1], 1 }
 0x15e   :  { %471 = vsyncpa [#allocation9], 1 }
 0x15f   :  { %473 = vsyncpa [#allocation9 + $0x1], 1 }
 0x160   :  { %474 = vsyncpa [#allocation6], 1 }
 0x161   :  { %476 = vsyncpa [#allocation6 + $0x1], 1 }

</bundles_post_ra>
